<compile_context>
chip_gen: v6e
topology: v6e:2x2x1
jax: 0.10.0
libtpu: 0.0.40
codegen_flags: <defaults>
</compile_context>

<pallas_src>
import math

import jax
import jax.numpy as jnp
from jax.experimental import pallas as pl
from jax.experimental.pallas import tpu as pltpu


def twinq_kernel(xT_ref, w1T_ref, w2aT_ref, w2bT_ref, vec_ref, o_ref):
    """Fused twin-Q forward. Transposed orientation: features in sublanes, batch in lanes.

    xT_ref  : (D, TB)      f32   state||action, transposed batch tile
    w1T_ref : (2H, D)      bf16  fused layer-1 weights for both heads
    w2aT_ref: (H, H)       bf16  layer-2 weight, head 1 (transposed)
    w2bT_ref: (H, H)       bf16  layer-2 weight, head 2 (transposed)
    vec_ref : (6H+2, 1)    f32   [b1(2H) | b2a(H) | b2b(H) | w3a(H) | w3b(H) | b3a | b3b]
    o_ref   : (1, TB)      f32   min(q1, q2), lane-dense
    """
    H = w2aT_ref.shape[0]

    # Layer 1: both heads fused, single K = S+A matmul; bf16 operands, f32 accumulate.
    xT = xT_ref[...].astype(jnp.bfloat16)                                   # (D, TB)
    b1 = vec_ref[0:2 * H, :]                                                # (2H, 1)
    h = jnp.dot(w1T_ref[...], xT, preferred_element_type=jnp.float32) + b1  # (2H, TB)
    h = jnp.maximum(h, 0.0)                                                 # ReLU in f32
    hb = h.astype(jnp.bfloat16)

    # Layer 2: per head (inputs differ). Sublane-aligned static slices (H % 128 == 0).
    b2a = vec_ref[2 * H:3 * H, :]
    b2b = vec_ref[3 * H:4 * H, :]
    h1 = jnp.maximum(
        jnp.dot(w2aT_ref[...], hb[:H, :], preferred_element_type=jnp.float32) + b2a, 0.0)
    h2 = jnp.maximum(
        jnp.dot(w2bT_ref[...], hb[H:, :], preferred_element_type=jnp.float32) + b2b, 0.0)

    # Layer 3 (out_features = 1): VPU multiply + cross-sublane reduce -> lane-dense (1, TB).
    w3a = vec_ref[4 * H:5 * H, :]
    w3b = vec_ref[5 * H:6 * H, :]
    b3a = vec_ref[6 * H:6 * H + 1, :]
    b3b = vec_ref[6 * H + 1:6 * H + 2, :]
    q1 = jnp.sum(h1 * w3a, axis=0, keepdims=True) + b3a                     # (1, TB)
    q2 = jnp.sum(h2 * w3b, axis=0, keepdims=True) + b3b                     # (1, TB)

    o_ref[...] = jnp.minimum(q1, q2).astype(o_ref.dtype)


def _round_up(x, m):
    return (x + m - 1) // m * m


def init_linear(key, in_dim, out_dim):
    """Deterministic init mimicking torch.nn.Linear defaults (uniform +-1/sqrt(fan_in))."""
    kw, kb = jax.random.split(key)
    bound = 1.0 / math.sqrt(in_dim)
    w = jax.random.uniform(kw, (in_dim, out_dim), jnp.float32, -bound, bound)
    b = jax.random.uniform(kb, (1, out_dim), jnp.float32, -bound, bound)
    return w, b


def make_twinq_params(key, state_dim, action_dim, hidden_dim=256, n_hidden=2):
    assert n_hidden == 2, "this kernel is specialized to the default n_hidden=2"
    d_in = state_dim + action_dim
    keys = jax.random.split(key, 6)
    w1a, b1a = init_linear(keys[0], d_in, hidden_dim)
    w2a, b2a = init_linear(keys[1], hidden_dim, hidden_dim)
    w3a, b3a = init_linear(keys[2], hidden_dim, 1)
    w1b, b1b = init_linear(keys[3], d_in, hidden_dim)
    w2b, b2b = init_linear(keys[4], hidden_dim, hidden_dim)
    w3b, b3b = init_linear(keys[5], hidden_dim, 1)
    return (w1a, b1a, w2a, b2a, w3a, b3a,
            w1b, b1b, w2b, b2b, w3b, b3b)


def pack_twinq_params(raw, weight_dtype=jnp.bfloat16):
    """One-time repack of torch-layout params into the fused, transposed kernel layout.

    Matmul weights default to bf16 (native MXU rate, half the DMA/VMEM); biases and
    the final-layer row vectors stay f32 (they are VPU-only).
    """
    (w1a, b1a, w2a, b2a, w3a, b3a,
     w1b, b1b, w2b, b2b, w3b, b3b) = raw
    H = w2a.shape[0]
    assert H % 128 == 0, "hidden_dim must be a multiple of 128 for aligned head slices"

    # Fuse the two heads' layer-1 weights ([D,H]|[D,H] -> [D,2H]) and transpose.
    w1T = jnp.concatenate([w1a, w1b], axis=1).T.astype(weight_dtype)      # (2H, D)
    w2aT = w2a.T.astype(weight_dtype)                                     # (H, H)
    w2bT = w2b.T.astype(weight_dtype)                                     # (H, H)

    # All tiny parameters packed into one (6H+2, 1) f32 column vector.
    vec = jnp.concatenate([
        b1a.reshape(-1), b1b.reshape(-1),      # b1, fused-head order   (2H)
        b2a.reshape(-1), b2b.reshape(-1),      # layer-2 biases         (H, H)
        w3a.reshape(-1), w3b.reshape(-1),      # final-layer rows       (H, H)
        b3a.reshape(-1), b3b.reshape(-1),      # final-layer biases     (1, 1)
    ]).astype(jnp.float32).reshape(-1, 1)                                  # (6H+2, 1)

    return (w1T, w2aT, w2bT, vec)


def twinq_forward(state, action, packed_params, *, block_b=1024):
    """min(q1, q2) with both 3-layer MLPs fused into one Pallas kernel."""
    w1T, w2aT, w2bT, vec = packed_params
    H = w2aT.shape[0]
    assert H % 128 == 0

    state = state.astype(jnp.float32)
    action = action.astype(jnp.float32)
    B, S = state.shape
    A = action.shape[1]
    D = S + A
    assert w1T.shape == (2 * H, D)

    # Layer-1 fusion across the concat: one K = S+A matmul. Concat + transpose in
    # the wrapper costs ~B*D*4 bytes of HBM traffic (negligible).
    sa = jnp.concatenate([state, action], axis=1)                          # (B, D)

    # Lane-dense batch tile (multiple of 128). Small batches -> single grid step;
    # large batches -> multiple steps so "parallel" shards across v7x's 2 TCs.
    TB = max(128, min(_round_up(block_b, 128), _round_up(B, 128)))
    B_pad = _round_up(B, TB)
    if B_pad != B:
        sa = jnp.pad(sa, ((0, B_pad - B), (0, 0)))
    xT = sa.T                                                              # (D, B_pad)
    grid = (B_pad // TB,)

    def resident_spec(arr):
        # Constant index_map -> same block every grid step -> weights stay in VMEM.
        return pl.BlockSpec(arr.shape, lambda i: (0, 0))

    in_specs = [
        pl.BlockSpec((D, TB), lambda i: (0, i)),        # batch tile (lanes)
        resident_spec(w1T),
        resident_spec(w2aT),
        resident_spec(w2bT),
        resident_spec(vec),
    ]

    param_bytes = sum(int(a.size) * int(a.dtype.itemsize)
                      for a in (w1T, w2aT, w2bT, vec))
    flops = 2 * B_pad * (D * 2 * H + 2 * H * H + 2 * H)
    bytes_accessed = param_bytes + B_pad * (D + 1) * 4

    out = pl.pallas_call(
        twinq_kernel,
        out_shape=jax.ShapeDtypeStruct((1, B_pad), jnp.float32),
        grid=grid,
        in_specs=in_specs,
        out_specs=pl.BlockSpec((1, TB), lambda i: (0, i)),   # lane-dense output row
        compiler_params=pltpu.CompilerParams(
            dimension_semantics=("parallel",)),
        cost_estimate=pl.CostEstimate(
            flops=int(flops),
            transcendentals=0,
            bytes_accessed=int(bytes_accessed)),
    )(xT, w1T, w2aT, w2bT, vec)

    # torch Squeeze(-1): -> (B,), dropping padded (garbage) batch columns.
    return out[0, :B]


def twinq_reference(state, action, raw_params):
    (w1a, b1a, w2a, b2a, w3a, b3a,
     w1b, b1b, w2b, b2b, w3b, b3b) = raw_params
    sa = jnp.concatenate([state, action], axis=1).astype(jnp.float32)

    def mlp(w1, b1, w2, b2, w3, b3):
        h = jnp.maximum(sa @ w1 + b1, 0.0)
        h = jnp.maximum(h @ w2 + b2, 0.0)
        return (h @ w3 + b3)[:, 0]

    q1 = mlp(w1a, b1a, w2a, b2a, w3a, b3a)
    q2 = mlp(w1b, b1b, w2b, b2b, w3b, b3b)
    return jnp.minimum(q1, q2)


if __name__ == "__main__":
    key = jax.random.PRNGKey(0)
    k_state, k_action, k_params = jax.random.split(key, 3)

    batch = 300          # not a multiple of the tile -> exercises padding
    state_dim = 12
    action_dim = 4
    hidden_dim = 128     # multiple of 128 (module default is 256, also fine)

    state = jax.random.normal(k_state, (batch, state_dim), jnp.float32)
    action = jax.random.normal(k_action, (batch, action_dim), jnp.float32)

    raw_params = make_twinq_params(k_params, state_dim, action_dim,
                                   hidden_dim=hidden_dim)
    packed_params = pack_twinq_params(raw_params)   # bf16 weights by default

    # Small batch tile so the demo runs a multi-step (pipelined) grid: 3 steps.
    q_min = twinq_forward(state, action, packed_params, block_b=128)
    q_min = jax.block_until_ready(q_min)

    q_ref = twinq_reference(state, action, raw_params)
    assert q_min.shape == (batch,), q_min.shape
    # bf16 matmul path -> loosened tolerance vs. the f32 reference.
    assert jnp.allclose(q_min, q_ref, atol=5e-2, rtol=5e-2), (
        float(jnp.max(jnp.abs(q_min - q_ref))))

    print("KERNEL_OK")
</pallas_src>

<mosaic_0001>
module attributes {stable_mosaic.version = 11 : i64} {
  func.func @twinq_kernel(%arg0: i32, %arg1: memref<16x128xf32, #tpu.memory_space<vmem>>, %arg2: memref<256x16xbf16, #tpu.memory_space<vmem>>, %arg3: memref<128x128xbf16, #tpu.memory_space<vmem>>, %arg4: memref<128x128xbf16, #tpu.memory_space<vmem>>, %arg5: memref<770x1xf32, #tpu.memory_space<vmem>>, %arg6: memref<1x128xf32, #tpu.memory_space<vmem>>) attributes {dimension_semantics = [#tpu.dimension_semantics<parallel>], iteration_bounds = array<i64: 3>, scalar_prefetch = 0 : i64, scratch_operands = 0 : i64, tpu.core_type = #tpu.core_type<tc>, window_params = [{transform_indices = @transform_0, window_bounds = array<i64: 16, 128>}, {pipeline_mode = #tpu.pipeline_mode<synchronous>, transform_indices = @transform_1, window_bounds = array<i64: 256, 16>}, {pipeline_mode = #tpu.pipeline_mode<synchronous>, transform_indices = @transform_2, window_bounds = array<i64: 128, 128>}, {pipeline_mode = #tpu.pipeline_mode<synchronous>, transform_indices = @transform_3, window_bounds = array<i64: 128, 128>}, {pipeline_mode = #tpu.pipeline_mode<synchronous>, transform_indices = @transform_4, window_bounds = array<i64: 770, 1>}, {transform_indices = @transform_5, window_bounds = array<i64: 1, 128>}]} {
    %c0 = arith.constant 0 : index
    %c0_0 = arith.constant 0 : index
    %0 = vector.load %arg1[%c0, %c0_0] : memref<16x128xf32, #tpu.memory_space<vmem>>, vector<16x128xf32>
    %1 = arith.truncf %0 : vector<16x128xf32> to vector<16x128xbf16>
    %c0_1 = arith.constant 0 : index
    %c0_2 = arith.constant 0 : index
    %2 = vector.load %arg5[%c0_1, %c0_2] : memref<770x1xf32, #tpu.memory_space<vmem>>, vector<256x1xf32>
    %c0_3 = arith.constant 0 : index
    %c0_4 = arith.constant 0 : index
    %3 = vector.load %arg2[%c0_3, %c0_4] : memref<256x16xbf16, #tpu.memory_space<vmem>>, vector<256x16xbf16>
    %cst = arith.constant dense<0.000000e+00> : vector<256x128xf32>
    %4 = tpu.matmul %3, %1, %cst {dimension_numbers = #tpu.dot_dimension_numbers<[1], [0], [0], [1], [0, 0, 1, 1], [], []>} : vector<256x16xbf16>, vector<16x128xbf16>, vector<256x128xf32> -> vector<256x128xf32>
    %5 = vector.broadcast %2 : vector<256x1xf32> to vector<256x128xf32>
    %6 = arith.addf %4, %5 : vector<256x128xf32>
    %cst_5 = arith.constant 0.000000e+00 : f32
    %7 = vector.broadcast %cst_5 : f32 to vector<256x128xf32>
    %8 = arith.maximumf %6, %7 : vector<256x128xf32>
    %9 = arith.truncf %8 : vector<256x128xf32> to vector<256x128xbf16>
    %c256 = arith.constant 256 : index
    %c0_6 = arith.constant 0 : index
    %10 = vector.load %arg5[%c256, %c0_6] : memref<770x1xf32, #tpu.memory_space<vmem>>, vector<128x1xf32>
    %c384 = arith.constant 384 : index
    %c0_7 = arith.constant 0 : index
    %11 = vector.load %arg5[%c384, %c0_7] : memref<770x1xf32, #tpu.memory_space<vmem>>, vector<128x1xf32>
    %c0_8 = arith.constant 0 : index
    %c0_9 = arith.constant 0 : index
    %12 = vector.load %arg3[%c0_8, %c0_9] : memref<128x128xbf16, #tpu.memory_space<vmem>>, vector<128x128xbf16>
    %13 = vector.extract_strided_slice %9 {offsets = [0, 0], sizes = [128, 128], strides = [1, 1]} : vector<256x128xbf16> to vector<128x128xbf16>
    %cst_10 = arith.constant dense<0.000000e+00> : vector<128x128xf32>
    %14 = tpu.matmul %12, %13, %cst_10 {dimension_numbers = #tpu.dot_dimension_numbers<[1], [0], [0], [1], [0, 0, 1, 1], [], []>} : vector<128x128xbf16>, vector<128x128xbf16>, vector<128x128xf32> -> vector<128x128xf32>
    %15 = vector.broadcast %10 : vector<128x1xf32> to vector<128x128xf32>
    %16 = arith.addf %14, %15 : vector<128x128xf32>
    %cst_11 = arith.constant 0.000000e+00 : f32
    %17 = vector.broadcast %cst_11 : f32 to vector<128x128xf32>
    %18 = arith.maximumf %16, %17 : vector<128x128xf32>
    %c0_12 = arith.constant 0 : index
    %c0_13 = arith.constant 0 : index
    %19 = vector.load %arg4[%c0_12, %c0_13] : memref<128x128xbf16, #tpu.memory_space<vmem>>, vector<128x128xbf16>
    %20 = vector.extract_strided_slice %9 {offsets = [128, 0], sizes = [128, 128], strides = [1, 1]} : vector<256x128xbf16> to vector<128x128xbf16>
    %cst_14 = arith.constant dense<0.000000e+00> : vector<128x128xf32>
    %21 = tpu.matmul %19, %20, %cst_14 {dimension_numbers = #tpu.dot_dimension_numbers<[1], [0], [0], [1], [0, 0, 1, 1], [], []>} : vector<128x128xbf16>, vector<128x128xbf16>, vector<128x128xf32> -> vector<128x128xf32>
    %22 = vector.broadcast %11 : vector<128x1xf32> to vector<128x128xf32>
    %23 = arith.addf %21, %22 : vector<128x128xf32>
    %cst_15 = arith.constant 0.000000e+00 : f32
    %24 = vector.broadcast %cst_15 : f32 to vector<128x128xf32>
    %25 = arith.maximumf %23, %24 : vector<128x128xf32>
    %c512 = arith.constant 512 : index
    %c0_16 = arith.constant 0 : index
    %26 = vector.load %arg5[%c512, %c0_16] : memref<770x1xf32, #tpu.memory_space<vmem>>, vector<128x1xf32>
    %c640 = arith.constant 640 : index
    %c0_17 = arith.constant 0 : index
    %27 = vector.load %arg5[%c640, %c0_17] : memref<770x1xf32, #tpu.memory_space<vmem>>, vector<128x1xf32>
    %c768 = arith.constant 768 : index
    %c0_18 = arith.constant 0 : index
    %28 = vector.load %arg5[%c768, %c0_18] : memref<770x1xf32, #tpu.memory_space<vmem>>, vector<1x1xf32>
    %c769 = arith.constant 769 : index
    %c0_19 = arith.constant 0 : index
    %29 = vector.load %arg5[%c769, %c0_19] : memref<770x1xf32, #tpu.memory_space<vmem>>, vector<1x1xf32>
    %30 = vector.broadcast %26 : vector<128x1xf32> to vector<128x128xf32>
    %31 = arith.mulf %18, %30 : vector<128x128xf32>
    %cst_20 = arith.constant dense<0.000000e+00> : vector<128xf32>
    %32 = vector.multi_reduction <add>, %31, %cst_20 [0] : vector<128x128xf32> to vector<128xf32>
    %33 = vector.shape_cast %32 : vector<128xf32> to vector<1x128xf32>
    %34 = vector.broadcast %28 : vector<1x1xf32> to vector<1x128xf32>
    %35 = arith.addf %33, %34 : vector<1x128xf32>
    %36 = vector.broadcast %27 : vector<128x1xf32> to vector<128x128xf32>
    %37 = arith.mulf %25, %36 : vector<128x128xf32>
    %cst_21 = arith.constant dense<0.000000e+00> : vector<128xf32>
    %38 = vector.multi_reduction <add>, %37, %cst_21 [0] : vector<128x128xf32> to vector<128xf32>
    %39 = vector.shape_cast %38 : vector<128xf32> to vector<1x128xf32>
    %40 = vector.broadcast %29 : vector<1x1xf32> to vector<1x128xf32>
    %41 = arith.addf %39, %40 : vector<1x128xf32>
    %42 = arith.minimumf %35, %41 : vector<1x128xf32>
    %c0_22 = arith.constant 0 : index
    %c0_23 = arith.constant 0 : index
    %43 = vector.load %arg6[%c0_22, %c0_23] : memref<1x128xf32, #tpu.memory_space<vmem>>, vector<1x128xf32>
    tpu.vector_store %arg6[%c0_22, %c0_23], %42 {strides = array<i32>} : memref<1x128xf32, #tpu.memory_space<vmem>>, vector<1x128xf32>,
    return
  }
  func.func @transform_0(%arg0: i32) -> (i32, i32) {
    %c0_i32 = arith.constant 0 : i32
    %c0_i32_0 = arith.constant 0 : i32
    return %c0_i32, %arg0 : i32, i32
  }
  func.func @transform_1(%arg0: i32) -> (i32, i32) {
    %c0_i32 = arith.constant 0 : i32
    %c0_i32_0 = arith.constant 0 : i32
    %c0_i32_1 = arith.constant 0 : i32
    return %c0_i32, %c0_i32_0 : i32, i32
  }
  func.func @transform_2(%arg0: i32) -> (i32, i32) {
    %c0_i32 = arith.constant 0 : i32
    %c0_i32_0 = arith.constant 0 : i32
    %c0_i32_1 = arith.constant 0 : i32
    return %c0_i32, %c0_i32_0 : i32, i32
  }
  func.func @transform_3(%arg0: i32) -> (i32, i32) {
    %c0_i32 = arith.constant 0 : i32
    %c0_i32_0 = arith.constant 0 : i32
    %c0_i32_1 = arith.constant 0 : i32
    return %c0_i32, %c0_i32_0 : i32, i32
  }
  func.func @transform_4(%arg0: i32) -> (i32, i32) {
    %c0_i32 = arith.constant 0 : i32
    %c0_i32_0 = arith.constant 0 : i32
    %c0_i32_1 = arith.constant 0 : i32
    return %c0_i32, %c0_i32_0 : i32, i32
  }
  func.func @transform_5(%arg0: i32) -> (i32, i32) {
    %c0_i32 = arith.constant 0 : i32
    %c0_i32_0 = arith.constant 0 : i32
    return %c0_i32, %arg0 : i32, i32
  }
}

</mosaic_0001>

<bundles_post_ra>
// kernel: tpu_custom_call.1
= control target key start
LH: loop header
LB: loop body
LE: loop exit
PB: predicated region body
PF: predicated region fallthrough
CT: control target
= control target key end

     0   :  { %10 = vsyncpa [#allocation4], 0  ;;  %s2780_s0 = inlined_call_operand.vmem [shape: f32[16,384], index: 0, kind: input, shape index: {}]   ;;  %s2781_s1 = inlined_call_operand.vmem [shape: bf16[256,16], index: 1, kind: input, shape index: {}]   ;;  %s2782_s2 = inlined_call_operand.vmem [shape: bf16[128,128], index: 2, kind: input, shape index: {}]   ;;  %s2783_s3 = inlined_call_operand.vmem [shape: bf16[128,128], index: 3, kind: input, shape index: {}]   ;;  %s2784_s4 = inlined_call_operand.vmem [shape: f32[770,1], index: 4, kind: input, shape index: {}]   ;;  %s2785_s5 = inlined_call_operand.hbm [shape: f32[1,384], index: 5, kind: output, shape index: {}]  }
   0x1   :  { %12 = vsyncpa [#allocation4 + $0x1], 0  ;;  %s2118_s18 = smov 0   ;;  %s2120_s19 = smov 0  }
   0x2   :  { %s2122_s20 = smov 0   ;;  %s2124_s21 = smov 0  }
   0x3 LB: > { %s1728_s22 = sadd.s32 4294967295, %s2084_s21   ;;  %s1729_s23 = sadd.s32 4294967294, %s2084_s21   ;;  %s2084_s21 = sphi %s2124_s21, %s2793_s21   ;;  %s2080_s20 = sphi %s2122_s20, %s2792_s20   ;;  %s2076_s19 = sphi %s2120_s19, %s2791_s19   ;;  %s2072_s18 = sphi %s2118_s18, %s2790_s18  }
   0x4   : > { %s2141_s24 = sadd.s32 1, %s2084_s21   ;;  %s25_s25 = sadd.s32 1, %s2080_s20 }
   0x5   : > { %s22_s26 = ssub.s32 %s2084_s21, %s2141_s24  ;;  %p32_p0 = scmp.ne.s32.totalorder %s2080_s20, %s2076_s19 }
   0x6   : > { %p23_p1 = scmp.eq.s32.totalorder %s22_s26, 0  ;;  %p33_p2 = scmp.eq.s32.totalorder %s2084_s21, 0 }
   0x7   : > { %p146_p3 = scmp.eq.s32.totalorder %s1728_s22, 2  ;;  %p151_p4 = scmp.ne.s32.totalorder %s2076_s19, %s2072_s18 }
   0x8   : > { %s2154_s27 = scalar_select %p23_p1, %s2080_s20, %s25_s25  }
   0x9   : > { %p34_p5 = por %p33_p2, %p32_p0  ;;  %p2156_p6 = por %p146_p3, %p32_p0 }
   0xa   : > { %p152_p7 = scmp.eq.s32.totalorder %s1729_s23, 2  ;;  %p1731_p9 = scmp.ge.s32.totalorder %s2084_s21, 3 }
   0xc   : > { %p2160_p8 = por %p152_p7, %p151_p4  ;;  %180 = sbr.rel (%p1731_p9) target bundleno = 22 (0x16), region = 32 }
  0x11   : > { %183 = sbr.rel (!%p34_p5) target bundleno = 22 (0x16), region = 36  ;;  %s185_s30 = sand.u32 (%p34_p5), 1, %s2080_s20  }
  0x12   : > { %s1733_s6 = sshll.u32 (%p34_p5), %s2084_s21, 3  ;;  %s1732_s7 = sshll.u32 (%p34_p5), %s185_s30, 4 }
  0x13   : > { %s189_s10 = scalar_lea.vmem (%p34_p5), %s2780_s0, %s1733_s6  ;;  %s187_s11 = scalar_lea.vmem (%p34_p5), [#allocation2], %s1732_s7 }
  0x14   : > { %v220_v0 = vld [vmem:[%s189_s10] sm:$0xff] (%p34_p5)  ;;  %v222_v1 = vld [vmem:[%s189_s10 + $0x18] sm:$0xff] (%p34_p5) }
  0x15   : > { %221 = vst [vmem:[%s187_s11] sm:$0xff] (%p34_p5), %v220_v0  ;;  %223 = vst [vmem:[%s187_s11 + $0x8] sm:$0xff] (%p34_p5), %v222_v1 }
  0x16 PF: > { %p1734_p10 = scmp.ge.s32.totalorder %s2084_s21, 1  ;;  %p228_p11 = scmp.lt.s32.totalorder %s2084_s21, 4 }
  0x18   : > { %p229_p12 = pnand %p1734_p10, %p228_p11 }
  0x1a   : > { %232 = sbr.rel (%p229_p12) target bundleno = 597 (0x255), region = 74 }
  0x1f   : > { %v267_v2 = vld [vmem:[%s2784_s4 + $0x10] sm:$0xff]  ;;  %v265_v3 = vld [vmem:[%s2784_s4] sm:$0xff]  ;;  %s2179_s16 = sand.u32 1, %s2076_s19   ;;  %v2086_v4 = vmov 0   ;;  %vm569_vm0 = vcmask 130048   ;;  %v268_v5 = vld [vmem:[%s2784_s4 + $0x18] sm:$0xff] }
  0x20   : > { %1991 = vset.pattern.permute.xlu1 %v2086_v4  ;;  %1990 = vset.pattern.permute.xlu0 %v2086_v4  ;;  %s1735_s17 = sshll.u32 %s2179_s16, 4  ;;  %v266_v6 = vld [vmem:[%s2784_s4 + $0x8] sm:$0xff]  ;;  %v1992_v7 = vld [vmem:[%s2781_s1] sm:$0xff]   ;;  %v280_v11 = vld [vmem:[%s2784_s4 + $0x78] sm:$0xff]  ;;  %s1784_s26 = sshll.u32 %s1728_s22, 4 }
  0x21   : > { %341 = vperm.xlu1 %1991, %v267_v2   ;;  %331 = vperm.xlu0 %1990, %v265_v3   ;;  %s237_s8 = scalar_lea.vmem [#allocation2], %s1735_s17  ;;  %v279_v12 = vld [vmem:[%s2784_s4 + $0x70] sm:$0xff]  ;;  %v1993_v13 = vld [vmem:[%s2781_s1 + $0x8] sm:$0xff]   ;;  %v277_v16 = vld [vmem:[%s2784_s4 + $0x60] sm:$0xff]  ;;  %s260_s30 = scalar_lea.vmem [#allocation3], %s2179_s16 }
  0x22   : > { %v262_v8 = vld [vmem:[%s237_s8] sm:$0xff]  ;;  %v263_v9 = vld [vmem:[%s237_s8 + $0x8] sm:$0xff]  ;;  %1838 = vmatprep.mubr.msk.bf16.mxu0 %vm569_vm0, %v1992_v7  ;;  %s1668_s6 = sshll.u32 %s260_s30, 4  ;;  %s1666_s9 = scalar_lea.hbm %s2785_s5, %s1784_s26  ;;  %s1669_s6 = int_to_ptr.vmem [resolvable:$true] %s1668_s6 }
  0x23   : > { %v264_v10 = vpack.c.bf16 %v263_v9, %v262_v8  ;;  %v1994_v14 = vld [vmem:[%s2781_s1 + $0x10] sm:$0xff]   ;;  %v278_v15 = vld [vmem:[%s2784_s4 + $0x68] sm:$0xff]  ;;  %v276_v17 = vld [vmem:[%s2784_s4 + $0x58] sm:$0xff]  ;;  %s1656_s10 = scalar_lea.sflag [#allocation4], %s2179_s16  ;;  %s2024_s11 = scalar_lea.vmem %s1669_s6, 16 }
  0x24   : > { %v275_v18 = vld [vmem:[%s2784_s4 + $0x50] sm:$0xff]  ;;  %v1995_v19 = vld [vmem:[%s2781_s1 + $0x18] sm:$0xff]   ;;  %v1996_v20 = vld [vmem:[%s2781_s1 + $0x20] sm:$0xff]   ;;  %p2025_p13 = scmp.ne.s32.totalorder %s1669_s6, %s2024_s11  ;;  %s2087_s12 = smov [#allocation3]  }
  0x25   : > { %346 = vperm.xlu1 %1991, %v268_v5   ;;  %336 = vperm.xlu0 %1990, %v266_v6   ;;  %v274_v21 = vld [vmem:[%s2784_s4 + $0x48] sm:$0xff]  ;;  %v273_v22 = vld [vmem:[%s2784_s4 + $0x40] sm:$0xff]  ;;  %v272_v23 = vld [vmem:[%s2784_s4 + $0x38] sm:$0xff]  ;;  %s2028_s13 = sshll.u32 %s2087_s12, 4  ;;  %s2029_s13 = int_to_ptr.vmem [resolvable:$false] %s2028_s13 }
  0x26   : > { %1836 = vmatprep.subr.bf16.mxu0 %v264_v10  ;;  %v271_v24 = vld [vmem:[%s2784_s4 + $0x30] sm:$0xff]  ;;  %v1997_v25 = vld [vmem:[%s2781_s1 + $0x28] sm:$0xff]   ;;  %v269_v28 = vld [vmem:[%s2784_s4 + $0x20] sm:$0xff]  ;;  %p2026_p0 = pnand %p2025_p13, %p2156_p6  ;;  %s2030_s22 = scalar_lea.vmem %s2029_s13, 32 }
  0x27   : > { %1837 = vmatpush3.bf16.msra.mxu0 %v264_v10  ;;  %v1998_v26 = vld [vmem:[%s2781_s1 + $0x30] sm:$0xff]   ;;  %v270_v27 = vld [vmem:[%s2784_s4 + $0x28] sm:$0xff]  ;;  %v296_v29 = vld [vmem:[%s2784_s4 + $0xf8] sm:$0xff]  ;;  %p2031_p2 = scmp.lt.s32.totalorder %s1669_s6, %s2029_s13  ;;  %p2032_p3 = scmp.lt.s32.totalorder %s2030_s22, %s2024_s11 }
  0x28   : > { %v295_v30 = vld [vmem:[%s2784_s4 + $0xf0] sm:$0xff]  ;;  %v1999_v31 = vld [vmem:[%s2781_s1 + $0x38] sm:$0xff]   ;;  %v2000_v32 = vld [vmem:[%s2781_s1 + $0x40] sm:$0xff]   ;;  %p2027_p1 = pneg %p2026_p0 }
  0x29   : > { %406 = vperm.xlu1 %1991, %v280_v11   ;;  %401 = vperm.xlu0 %1990, %v279_v12   ;;  %v294_v33 = vld [vmem:[%s2784_s4 + $0xe8] sm:$0xff]  ;;  %v293_v34 = vld [vmem:[%s2784_s4 + $0xe0] sm:$0xff]  ;;  %v292_v35 = vld [vmem:[%s2784_s4 + $0xd8] sm:$0xff]  ;;  %p2033_p4 = por %p2032_p3, %p2031_p2 }
  0x2a   : > { %1839 = vmatmul.mubr.msk.bf16.vlgmr.msra.gmra.mxu0 %vm569_vm0, %v1993_v13  ;;  %v291_v36 = vld [vmem:[%s2784_s4 + $0xd0] sm:$0xff]  ;;  %v2001_v37 = vld [vmem:[%s2781_s1 + $0x48] sm:$0xff]   ;;  %v289_v40 = vld [vmem:[%s2784_s4 + $0xc0] sm:$0xff] }
  0x2b   : > { %1842 = vmatprep.mubr.msk.bf16.mxu0 %vm569_vm0, %v1994_v14  ;;  %v2002_v38 = vld [vmem:[%s2781_s1 + $0x50] sm:$0xff]   ;;  %v290_v39 = vld [vmem:[%s2784_s4 + $0xc8] sm:$0xff]  ;;  %v288_v41 = vld [vmem:[%s2784_s4 + $0xb8] sm:$0xff]  ;;  %p2034_p5 = pnand %p2033_p4, %p2027_p1 }
  0x2c   : > { %v287_v42 = vld [vmem:[%s2784_s4 + $0xb0] sm:$0xff]  ;;  %v2003_v43 = vld [vmem:[%s2781_s1 + $0x58] sm:$0xff]   ;;  %v2004_v44 = vld [vmem:[%s2781_s1 + $0x60] sm:$0xff]  }
  0x2d   : > { %396 = vperm.xlu1 %1991, %v278_v15   ;;  %391 = vperm.xlu0 %1990, %v277_v16   ;;  %v286_v45 = vld [vmem:[%s2784_s4 + $0xa8] sm:$0xff]  ;;  %v285_v46 = vld [vmem:[%s2784_s4 + $0xa0] sm:$0xff]  ;;  %v284_v47 = vld [vmem:[%s2784_s4 + $0x98] sm:$0xff] }
  0x2e   : > { %v283_v48 = vld [vmem:[%s2784_s4 + $0x90] sm:$0xff]  ;;  %v2005_v49 = vld [vmem:[%s2781_s1 + $0x68] sm:$0xff]   ;;  %v281_v52 = vld [vmem:[%s2784_s4 + $0x80] sm:$0xff] }
  0x2f   : > { %v2006_v50 = vld [vmem:[%s2781_s1 + $0x70] sm:$0xff]   ;;  %v282_v51 = vld [vmem:[%s2784_s4 + $0x88] sm:$0xff]  ;;  %v827_v54 = vld [vmem:[%s2784_s4 + $0x100] sm:$0xff] }
  0x30   : > { %v828_v53 = vld [vmem:[%s2784_s4 + $0x108] sm:$0xff]  ;;  %v2007_v55 = vld [vmem:[%s2781_s1 + $0x78] sm:$0xff]   ;;  %v829_v57 = vld [vmem:[%s2784_s4 + $0x110] sm:$0xff] }
  0x31   : > { %386 = vperm.xlu1 %1991, %v276_v17   ;;  %381 = vperm.xlu0 %1990, %v275_v18   ;;  %v830_v56 = vld [vmem:[%s2784_s4 + $0x118] sm:$0xff]  ;;  %v832_v58 = vld [vmem:[%s2784_s4 + $0x128] sm:$0xff]  ;;  %v831_v59 = vld [vmem:[%s2784_s4 + $0x120] sm:$0xff] }
  0x32   : > { %1843 = vmatmul.mubr.msk.bf16.gmra.mxu0 %vm569_vm0, %v1995_v19  ;;  %v834_v60 = vld [vmem:[%s2784_s4 + $0x138] sm:$0xff]  ;;  %v833_v61 = vld [vmem:[%s2784_s4 + $0x130] sm:$0xff]  ;;  %v836_v62 = vld [vmem:[%s2784_s4 + $0x148] sm:$0xff] }
  0x33   : > { %1846 = vmatprep.mubr.msk.bf16.mxu0 %vm569_vm0, %v1996_v20  ;;  %v835_v63 = vld [vmem:[%s2784_s4 + $0x140] sm:$0xff]  ;;  %v838_v0 = vld [vmem:[%s2784_s4 + $0x158] sm:$0xff]  ;;  %v837_v1 = vld [vmem:[%s2784_s4 + $0x150] sm:$0xff] }
  0x34   : > { %v840_v2 = vld [vmem:[%s2784_s4 + $0x168] sm:$0xff]  ;;  %v839_v3 = vld [vmem:[%s2784_s4 + $0x160] sm:$0xff]  ;;  %v842_v4 = vld [vmem:[%s2784_s4 + $0x178] sm:$0xff] }
  0x35   : > { %376 = vperm.xlu1 %1991, %v274_v21   ;;  %371 = vperm.xlu0 %1990, %v273_v22   ;;  %v841_v5 = vld [vmem:[%s2784_s4 + $0x170] sm:$0xff]  ;;  %v844_v6 = vld [vmem:[%s2784_s4 + $0x188] sm:$0xff]  ;;  %v843_v7 = vld [vmem:[%s2784_s4 + $0x180] sm:$0xff] }
  0x36   : > { %v846_v8 = vld [vmem:[%s2784_s4 + $0x198] sm:$0xff]  ;;  %v845_v9 = vld [vmem:[%s2784_s4 + $0x190] sm:$0xff]  ;;  %v848_v10 = vld [vmem:[%s2784_s4 + $0x1a8] sm:$0xff] }
  0x37   : > { %v847_v11 = vld [vmem:[%s2784_s4 + $0x1a0] sm:$0xff]  ;;  %v850_v12 = vld [vmem:[%s2784_s4 + $0x1b8] sm:$0xff]  ;;  %v849_v13 = vld [vmem:[%s2784_s4 + $0x1b0] sm:$0xff] }
  0x38   : > { %v852_v14 = vld [vmem:[%s2784_s4 + $0x1c8] sm:$0xff]  ;;  %v851_v15 = vld [vmem:[%s2784_s4 + $0x1c0] sm:$0xff]  ;;  %v854_v16 = vld [vmem:[%s2784_s4 + $0x1d8] sm:$0xff] }
  0x39   : > { %366 = vperm.xlu1 %1991, %v272_v23   ;;  %361 = vperm.xlu0 %1990, %v271_v24   ;;  %v853_v17 = vld [vmem:[%s2784_s4 + $0x1d0] sm:$0xff]  ;;  %v856_v18 = vld [vmem:[%s2784_s4 + $0x1e8] sm:$0xff]  ;;  %v855_v19 = vld [vmem:[%s2784_s4 + $0x1e0] sm:$0xff] }
  0x3a   : > { %1847 = vmatmul.mubr.msk.bf16.gmra.mxu0 %vm569_vm0, %v1997_v25  ;;  %v858_v20 = vld [vmem:[%s2784_s4 + $0x1f8] sm:$0xff]  ;;  %v857_v21 = vld [vmem:[%s2784_s4 + $0x1f0] sm:$0xff]  ;;  %v1374_v22 = vld [vmem:[%s2784_s4 + $0x208] sm:$0xff] }
  0x3b   : > { %1850 = vmatprep.mubr.msk.bf16.mxu0 %vm569_vm0, %v1998_v26  ;;  %v1373_v23 = vld [vmem:[%s2784_s4 + $0x200] sm:$0xff]  ;;  %v1376_v24 = vld [vmem:[%s2784_s4 + $0x218] sm:$0xff]  ;;  %v1375_v25 = vld [vmem:[%s2784_s4 + $0x210] sm:$0xff] }
  0x3c   : > { %v1378_v26 = vld [vmem:[%s2784_s4 + $0x228] sm:$0xff] }
  0x3d   : > { %356 = vperm.xlu1 %1991, %v270_v27   ;;  %351 = vperm.xlu0 %1990, %v269_v28   ;;  %v1377_v27 = vld [vmem:[%s2784_s4 + $0x220] sm:$0xff]  ;;  %v1390_v28 = vld [vmem:[%s2784_s4 + $0x288] sm:$0xff] }
  0x41   : > { %486 = vperm.xlu1 %1991, %v296_v29   ;;  %481 = vperm.xlu0 %1990, %v295_v30   ;;  %v1389_v29 = vld [vmem:[%s2784_s4 + $0x280] sm:$0xff] }
  0x42   : > { %1851 = vmatmul.mubr.msk.bf16.gmra.mxu0 %vm569_vm0, %v1999_v31  ;;  %v2008_v30 = vld [vmem:[%s2782_s2] sm:$0xff]   ;;  %v1392_v31 = vld [vmem:[%s2784_s4 + $0x298] sm:$0xff] }
  0x43   : > { %1854 = vmatprep.mubr.msk.bf16.mxu0 %vm569_vm0, %v2000_v32  ;;  %1886 = vmatprep.mubr.bf16.mxu1 %v2008_v30  ;;  %v1391_v32 = vld [vmem:[%s2784_s4 + $0x290] sm:$0xff] }
  0x45   : > { %476 = vperm.xlu1 %1991, %v294_v33   ;;  %471 = vperm.xlu0 %1990, %v293_v34   ;;  %v1394_v33 = vld [vmem:[%s2784_s4 + $0x2a8] sm:$0xff]  ;;  %v1393_v34 = vld [vmem:[%s2784_s4 + $0x2a0] sm:$0xff] }
  0x49   : > { %466 = vperm.xlu1 %1991, %v292_v35   ;;  %461 = vperm.xlu0 %1990, %v291_v36   ;;  %v1395_v35 = vld [vmem:[%s2784_s4 + $0x2b0] sm:$0xff] }
  0x4a   : > { %1855 = vmatmul.mubr.msk.bf16.gmra.mxu0 %vm569_vm0, %v2001_v37  ;;  %v1379_v36 = vld [vmem:[%s2784_s4 + $0x230] sm:$0xff]  ;;  %v1396_v37 = vld [vmem:[%s2784_s4 + $0x2b8] sm:$0xff] }
  0x4b   : > { %1858 = vmatprep.mubr.msk.bf16.mxu0 %vm569_vm0, %v2002_v38  ;;  %v1380_v38 = vld [vmem:[%s2784_s4 + $0x238] sm:$0xff] }
  0x4d   : > { %456 = vperm.xlu1 %1991, %v290_v39   ;;  %451 = vperm.xlu0 %1990, %v289_v40   ;;  %v1397_v39 = vld [vmem:[%s2784_s4 + $0x2c0] sm:$0xff] }
  0x4e   : > { %v1381_v40 = vld [vmem:[%s2784_s4 + $0x240] sm:$0xff] }
  0x51   : > { %446 = vperm.xlu1 %1991, %v288_v41   ;;  %441 = vperm.xlu0 %1990, %v287_v42   ;;  %v1398_v41 = vld [vmem:[%s2784_s4 + $0x2c8] sm:$0xff] }
  0x52   : > { %1859 = vmatmul.mubr.msk.bf16.gmra.mxu0 %vm569_vm0, %v2003_v43  ;;  %v1382_v42 = vld [vmem:[%s2784_s4 + $0x248] sm:$0xff]  ;;  %v1399_v43 = vld [vmem:[%s2784_s4 + $0x2d0] sm:$0xff] }
  0x53   : > { %1862 = vmatprep.mubr.msk.bf16.mxu0 %vm569_vm0, %v2004_v44  ;;  %v1383_v44 = vld [vmem:[%s2784_s4 + $0x250] sm:$0xff] }
  0x55   : > { %436 = vperm.xlu1 %1991, %v286_v45   ;;  %431 = vperm.xlu0 %1990, %v285_v46   ;;  %v1400_v45 = vld [vmem:[%s2784_s4 + $0x2d8] sm:$0xff] }
  0x56   : > { %v1384_v46 = vld [vmem:[%s2784_s4 + $0x258] sm:$0xff] }
  0x59   : > { %426 = vperm.xlu1 %1991, %v284_v47   ;;  %421 = vperm.xlu0 %1990, %v283_v48   ;;  %v2016_v47 = vld [vmem:[%s2783_s3] sm:$0xff]  }
  0x5a   : > { %1863 = vmatmul.mubr.msk.bf16.gmra.mxu0 %vm569_vm0, %v2005_v49  ;;  %v1401_v48 = vld [vmem:[%s2784_s4 + $0x2e0] sm:$0xff] }
  0x5b   : > { %1866 = vmatprep.mubr.msk.bf16.mxu0 %vm569_vm0, %v2006_v50  ;;  %v1385_v49 = vld [vmem:[%s2784_s4 + $0x260] sm:$0xff]  ;;  %v1402_v50 = vld [vmem:[%s2784_s4 + $0x2e8] sm:$0xff] }
  0x5d   : > { %416 = vperm.xlu1 %1991, %v282_v51   ;;  %411 = vperm.xlu0 %1990, %v281_v52   ;;  %v1386_v51 = vld [vmem:[%s2784_s4 + $0x268] sm:$0xff]  ;;  %v1403_v52 = vld [vmem:[%s2784_s4 + $0x2f0] sm:$0xff] }
  0x61   : > { %882 = vperm.xlu1 %1991, %v828_v53   ;;  %877 = vperm.xlu0 %1990, %v827_v54   ;;  %v1387_v53 = vld [vmem:[%s2784_s4 + $0x270] sm:$0xff]  ;;  %v1404_v54 = vld [vmem:[%s2784_s4 + $0x2f8] sm:$0xff] }
  0x62   : > { %1867 = vmatmul.mubr.msk.bf16.gmra.mxu0 %vm569_vm0, %v2007_v55  ;;  %v1388_v55 = vld [vmem:[%s2784_s4 + $0x278] sm:$0xff] }
  0x63   : > { %1918 = vmatprep.mubr.bf16.mxu0 %v2016_v47 }
  0x65   : > { %892 = vperm.xlu1 %1991, %v830_v56   ;;  %887 = vperm.xlu0 %1990, %v829_v57   ;;  %v1406_v56 = vld [vmem:[%s2784_s4 + $0x301] sm:$0x1]  ;;  %v1405_v57 = vld [vmem:[%s2784_s4 + $0x300] sm:$0x1] }
  0x69   : > { %902 = vperm.xlu1 %1991, %v832_v58   ;;  %897 = vperm.xlu0 %1990, %v831_v59  }
  0x6d   : > { %912 = vperm.xlu1 %1991, %v834_v60   ;;  %907 = vperm.xlu0 %1990, %v833_v61  }
  0x71   : > { %922 = vperm.xlu1 %1991, %v836_v62   ;;  %917 = vperm.xlu0 %1990, %v835_v63  }
  0x75   : > { %932 = vperm.xlu1 %1991, %v838_v0   ;;  %927 = vperm.xlu0 %1990, %v837_v1  }
  0x79   : > { %942 = vperm.xlu1 %1991, %v840_v2   ;;  %937 = vperm.xlu0 %1990, %v839_v3  }
  0x7d   : > { %952 = vperm.xlu1 %1991, %v842_v4   ;;  %947 = vperm.xlu0 %1990, %v841_v5  }
  0x81   : > { %1139 = vperm.xlu1 %1991, %v844_v6   ;;  %1134 = vperm.xlu0 %1990, %v843_v7  }
  0x85   : > { %1149 = vperm.xlu1 %1991, %v846_v8   ;;  %1144 = vperm.xlu0 %1990, %v845_v9  }
  0x89   : > { %1159 = vperm.xlu1 %1991, %v848_v10   ;;  %1154 = vperm.xlu0 %1990, %v847_v11  }
  0x8d   : > { %1169 = vperm.xlu1 %1991, %v850_v12   ;;  %1164 = vperm.xlu0 %1990, %v849_v13  }
  0x91   : > { %1179 = vperm.xlu1 %1991, %v852_v14   ;;  %1174 = vperm.xlu0 %1990, %v851_v15  }
  0x95   : > { %1189 = vperm.xlu1 %1991, %v854_v16   ;;  %1184 = vperm.xlu0 %1990, %v853_v17  }
  0x99   : > { %1199 = vperm.xlu1 %1991, %v856_v18   ;;  %1194 = vperm.xlu0 %1990, %v855_v19  }
  0x9c   : > { %v2540_v58 = vpop.permute.xlu1 %341  ;;  %v2542_v59 = vpop.permute.xlu0 %331 }
  0x9d   : > { %1209 = vperm.xlu1 %1991, %v858_v20   ;;  %1204 = vperm.xlu0 %1990, %v857_v21  }
  0xa0   : > { %v2544_v60 = vpop.permute.xlu1 %346  ;;  %v2546_v61 = vpop.permute.xlu0 %336 }
  0xa1   : > { %1414 = vperm.xlu1 %1991, %v1374_v22   ;;  %1409 = vperm.xlu0 %1990, %v1373_v23  }
  0xa4   : > { %v407_v0 = vpop.permute.xlu1 %406  ;;  %v402_v2 = vpop.permute.xlu0 %401 }
  0xa5   : > { %1424 = vperm.xlu1 %1991, %v1376_v24   ;;  %1419 = vperm.xlu0 %1990, %v1375_v25  }
  0xa8   : > { %v397_v5 = vpop.permute.xlu1 %396  ;;  %v392_v7 = vpop.permute.xlu0 %391 }
  0xa9   : > { %1434 = vperm.xlu1 %1991, %v1378_v26   ;;  %1429 = vperm.xlu0 %1990, %v1377_v27  }
  0xac   : > { %v387_v10 = vpop.permute.xlu1 %386  ;;  %v382_v12 = vpop.permute.xlu0 %381 }
  0xad   : > { %1537 = vperm.xlu1 %1991, %v1390_v28   ;;  %1532 = vperm.xlu0 %1990, %v1389_v29  }
  0xb0   : > { %v377_v15 = vpop.permute.xlu1 %376  ;;  %v372_v17 = vpop.permute.xlu0 %371 }
  0xb1   : > { %1547 = vperm.xlu1 %1991, %v1392_v31   ;;  %1542 = vperm.xlu0 %1990, %v1391_v32  }
  0xb4   : > { %v367_v21 = vpop.permute.xlu1 %366  ;;  %v362_v25 = vpop.permute.xlu0 %361 }
  0xb5   : > { %1557 = vperm.xlu1 %1991, %v1394_v33   ;;  %1552 = vperm.xlu0 %1990, %v1393_v34  }
  0xb9   : > { %1562 = vperm.xlu1 %1991, %v1395_v35   ;;  %1439 = vperm.xlu0 %1990, %v1379_v36   ;;  %v357_v36 = vpop.permute.xlu1 %356 }
  0xbd   : > { %1567 = vperm.xlu1 %1991, %v1396_v37   ;;  %1444 = vperm.xlu0 %1990, %v1380_v38  }
  0xc1   : > { %1572 = vperm.xlu1 %1991, %v1397_v39   ;;  %1449 = vperm.xlu0 %1990, %v1381_v40  }
  0xc5   : > { %1577 = vperm.xlu1 %1991, %v1398_v41   ;;  %1454 = vperm.xlu0 %1990, %v1382_v42   ;;  %v352_v41 = vpop.permute.xlu0 %351 }
  0xc9   : > { %1582 = vperm.xlu1 %1991, %v1399_v43   ;;  %1459 = vperm.xlu0 %1990, %v1383_v44  }
  0xcd   : > { %1587 = vperm.xlu1 %1991, %v1400_v45   ;;  %1464 = vperm.xlu0 %1990, %v1384_v46  }
  0xd1   : > { %1592 = vperm.xlu1 %1991, %v1401_v48   ;;  %1469 = vperm.xlu0 %1990, %v1385_v49   ;;  %v487_v49 = vpop.permute.xlu1 %486 }
  0xd5   : > { %1597 = vperm.xlu1 %1991, %v1402_v50   ;;  %1474 = vperm.xlu0 %1990, %v1386_v51  }
  0xd9   : > { %1602 = vperm.xlu1 %1991, %v1403_v52   ;;  %1479 = vperm.xlu0 %1990, %v1387_v53   ;;  %v482_v53 = vpop.permute.xlu0 %481 }
  0xdd   : > { %1607 = vperm.xlu1 %1991, %v1404_v54   ;;  %1484 = vperm.xlu0 %1990, %v1388_v55  }
  0xe1   : > { %1649 = vperm.xlu1 %1991, %v1406_v56   ;;  %1526 = vperm.xlu0 %1990, %v1405_v57  }
  0xea   : > { %v2548_v62 = vpop.f32.mrf.mxu0 }
  0xec   : > { %v2550_v63 = vpop.f32.mrf.mxu0 }
  0xee   : > { %v2552_v1 = vpop.f32.mrf.mxu0 }
  0xf0   : > { %v2554_v3 = vpop.f32.mrf.mxu0 }
  0xf2   : > { %v1844_v4 = vpop.f32.mrf.mxu0 }
  0xf3   : > { %v677_v51 = vadd.f32 %v1844_v4, %v362_v25  ;;  %v664_v4 = vadd.f32 %v2552_v1, %v2544_v60  ;;  %v653_v1 = vadd.f32 %v2550_v63, %v2542_v59 }
  0xf4   : > { %v668_v6 = vpop.f32.mrf.mxu0 }
  0xf6   : > { %v1845_v8 = vpop.f32.mrf.mxu0 }
  0xf7   : > { %v680_v46 = vadd.f32 %v1845_v8, %v367_v21 }
  0xf8   : > { %v671_v9 = vpop.f32.mrf.mxu0 }
  0xf9   : > { %v786_v55 = vmax.f32 %v680_v46, 0.0  ;;  %v672_v56 = vadd.f32 %v671_v9, %v357_v36  ;;  %v661_v9 = vadd.f32 %v2548_v62, %v2540_v58 }
  0xfa   : > { %v1848_v11 = vpop.f32.mrf.mxu0 }
  0xfb   : > { %v693_v32 = vadd.f32 %v1848_v11, %v382_v12  ;;  %v784_v11 = vmax.f32 %v672_v56, 0.0  ;;  %v472_v12 = vpop.permute.xlu0 %471  ;;  %v781_v60 = vmax.f32 %v661_v9, 0.0  ;;  %v2011_v56 = vld [vmem:[%s2782_s2 + $0x18] sm:$0xff]  }
  0xfc   : > { %v684_v13 = vpop.f32.mrf.mxu0 }
  0xfd   : > { %v789_v43 = vmax.f32 %v693_v32, 0.0  ;;  %v685_v44 = vadd.f32 %v684_v13, %v372_v17 }
  0xfe   : > { %v1849_v14 = vpop.f32.mrf.mxu0 }
  0xff   : > { %v696_v27 = vadd.f32 %v1849_v14, %v387_v10  ;;  %v787_v52 = vmax.f32 %v685_v44, 0.0 }
 0x100   : > { %v687_v16 = vpop.f32.mrf.mxu0 }
 0x101   : > { %v790_v38 = vmax.f32 %v696_v27, 0.0  ;;  %v688_v39 = vadd.f32 %v687_v16, %v377_v15  ;;  %v782_v16 = vmax.f32 %v664_v4, 0.0 }
 0x102   : > { %v1852_v18 = vpop.f32.mrf.mxu0 }
 0x103   : > { %v709_v20 = vadd.f32 %v1852_v18, %v402_v2  ;;  %v816_v47 = vpack.c.bf16 %v790_v38, %v789_v43  ;;  %v788_v48 = vmax.f32 %v688_v39, 0.0  ;;  %v785_v2 = vmax.f32 %v677_v51, 0.0  ;;  %v2010_v43 = vld [vmem:[%s2782_s2 + $0x10] sm:$0xff]  }
 0x104   : > { %v700_v19 = vpop.f32.mrf.mxu0 }
 0x105   : > { %v701_v23 = vadd.f32 %v700_v19, %v392_v7  ;;  %v793_v28 = vmax.f32 %v709_v20, 0.0  ;;  %v815_v57 = vpack.c.bf16 %v788_v48, %v787_v52  ;;  %v477_v7 = vpop.permute.xlu1 %476  ;;  %v814_v10 = vpack.c.bf16 %v786_v55, %v785_v2  ;;  %v462_v20 = vpop.permute.xlu0 %461  ;;  %v2012_v2 = vld [vmem:[%s2782_s2 + $0x20] sm:$0xff]  }
 0x106   : > { %v1853_v22 = vpop.f32.mrf.mxu0 }
 0x107   : > { %v712_v24 = vadd.f32 %v1853_v22, %v407_v0  ;;  %v791_v33 = vmax.f32 %v701_v23, 0.0  ;;  %v812_v22 = vpack.c.bf16 %v782_v16, %v781_v60  ;;  %v779_v23 = vmax.f32 %v653_v1, 0.0  ;;  %v2014_v16 = vld [vmem:[%s2782_s2 + $0x30] sm:$0xff]  }
 0x108   : > { %v703_v26 = vpop.f32.mrf.mxu0 }
 0x109   : > { %v794_v29 = vmax.f32 %v712_v24, 0.0  ;;  %v704_v30 = vadd.f32 %v703_v26, %v397_v5  ;;  %v669_v5 = vadd.f32 %v668_v6, %v352_v41  ;;  %v656_v6 = vadd.f32 %v2554_v3, %v2546_v61  ;;  %v467_v18 = vpop.permute.xlu1 %466  ;;  %v452_v26 = vpop.permute.xlu0 %451 }
 0x10a   : > { %v2556_v31 = vpop.f32.mrf.mxu0 }
 0x10b   : > { %v792_v34 = vmax.f32 %v704_v30, 0.0  ;;  %v818_v35 = vpack.c.bf16 %v794_v29, %v793_v28  ;;  %v783_v14 = vmax.f32 %v669_v5, 0.0  ;;  %v780_v58 = vmax.f32 %v656_v6, 0.0 }
 0x10c   : > { %v2558_v37 = vpop.f32.mrf.mxu0 }
 0x10d   : > { %v817_v40 = vpack.c.bf16 %v792_v34, %v791_v33  ;;  %1870 = vmatprep.subr.bf16.mxu1 %v818_v35  ;;  %v813_v17 = vpack.c.bf16 %v784_v11, %v783_v14  ;;  %v457_v24 = vpop.permute.xlu1 %456  ;;  %v811_v61 = vpack.c.bf16 %v780_v58, %v779_v23  ;;  %v2009_v34 = vld [vmem:[%s2782_s2 + $0x8] sm:$0xff]   ;;  %v442_v41 = vpop.permute.xlu0 %441  ;;  %v2019_v23 = vld [vmem:[%s2783_s3 + $0x18] sm:$0xff]  }
 0x10e   : > { %v2560_v42 = vpop.f32.mrf.mxu0  ;;  %1871 = vmatpush3.bf16.msra.mxu1 %v818_v35 }
 0x10f   : > { %1872 = vmatprep.subr.bf16.mxu1 %v817_v40 }
 0x110   : > { %v2562_v45 = vpop.f32.mrf.mxu0 }
 0x111   : > { %v447_v35 = vpop.permute.xlu1 %446 }
 0x112   : > { %v2564_v50 = vpop.f32.mrf.mxu0  ;;  %1873 = vmatpush3.bf16.msra.mxu1 %v817_v40 }
 0x113   : > { %1874 = vmatprep.subr.bf16.mxu1 %v816_v47  ;;  %v741_v5 = vadd.f32 %v2564_v50, %v442_v41 }
 0x114   : > { %v2566_v54 = vpop.f32.mrf.mxu0 }
 0x115   : > { %v437_v51 = vpop.permute.xlu1 %436 }
 0x116   : > { %v2568_v0 = vpop.f32.mrf.mxu0  ;;  %1875 = vmatpush3.bf16.msra.mxu1 %v816_v47 }
 0x117   : > { %1876 = vmatprep.subr.bf16.mxu1 %v815_v57  ;;  %v744_v52 = vadd.f32 %v2568_v0, %v447_v35 }
 0x118   : > { %v2570_v8 = vpop.f32.mrf.mxu0 }
 0x119   : > { %v802_v4 = vmax.f32 %v744_v52, 0.0  ;;  %v736_v0 = vadd.f32 %v2570_v8, %v437_v51  ;;  %v427_v11 = vpop.permute.xlu1 %426  ;;  %v2013_v8 = vld [vmem:[%s2782_s2 + $0x28] sm:$0xff]  }
 0x11a   : > { %v1864_v13 = vpop.f32.mrf.mxu0  ;;  %1877 = vmatpush3.bf16.msra.mxu1 %v815_v57  ;;  %v432_v57 = vpop.permute.xlu0 %431  ;;  %v728_v50 = vadd.f32 %v2560_v42, %v427_v11 }
 0x11b   : > { %1878 = vmatprep.subr.bf16.mxu1 %v814_v10  ;;  %v757_v36 = vadd.f32 %v1864_v13, %v462_v20  ;;  %v733_v13 = vadd.f32 %v2566_v54, %v432_v57 }
 0x11c   : > { %v748_v15 = vpop.f32.mrf.mxu0 }
 0x11d   : > { %v805_v48 = vmax.f32 %v757_v36, 0.0  ;;  %v799_v54 = vmax.f32 %v733_v13, 0.0 }
 0x11e   : > { %v1865_v19 = vpop.f32.mrf.mxu0  ;;  %1879 = vmatpush3.bf16.msra.mxu1 %v814_v10  ;;  %v422_v9 = vpop.permute.xlu0 %421 }
 0x11f   : > { %1880 = vmatprep.subr.bf16.mxu1 %v813_v17  ;;  %v760_v63 = vadd.f32 %v1865_v19, %v467_v18  ;;  %v725_v6 = vadd.f32 %v2556_v31, %v422_v9  ;;  %v798_v18 = vmax.f32 %v728_v50, 0.0 }
 0x120   : > { %v751_v21 = vpop.f32.mrf.mxu0 }
 0x121   : > { %v806_v44 = vmax.f32 %v760_v63, 0.0  ;;  %v752_v46 = vadd.f32 %v751_v21, %v457_v24  ;;  %v797_v1 = vmax.f32 %v725_v6, 0.0  ;;  %v2020_v24 = vld [vmem:[%s2783_s3 + $0x20] sm:$0xff]  }
 0x122   : > { %v1868_v62 = vpop.f32.mrf.mxu0  ;;  %1881 = vmatpush3.bf16.msra.mxu1 %v813_v17  ;;  %v417_v17 = vpop.permute.xlu1 %416 }
 0x123   : > { %1882 = vmatprep.subr.bf16.mxu1 %v812_v22  ;;  %v773_v3 = vadd.f32 %v1868_v62, %v482_v53  ;;  %v824_v53 = vpack.c.bf16 %v806_v44, %v805_v48  ;;  %v804_v55 = vmax.f32 %v752_v46, 0.0  ;;  %v720_v42 = vadd.f32 %v2562_v45, %v417_v17  ;;  %v412_v60 = vpop.permute.xlu0 %411  ;;  %v2017_v45 = vld [vmem:[%s2783_s3 + $0x10] sm:$0xff]  }
 0x124   : > { %v764_v25 = vpop.f32.mrf.mxu0  ;;  %v717_v20 = vadd.f32 %v2558_v37, %v412_v60  ;;  %v820_v31 = vpack.c.bf16 %v798_v18, %v797_v1  ;;  %v2018_v37 = vld [vmem:[%s2783_s3 + $0x8] sm:$0xff]  }
 0x125   : > { %v765_v28 = vadd.f32 %v764_v25, %v472_v12  ;;  %v809_v30 = vmax.f32 %v773_v3, 0.0  ;;  %v801_v12 = vmax.f32 %v741_v5, 0.0  ;;  %v796_v21 = vmax.f32 %v720_v42, 0.0  ;;  %v2021_v25 = vld [vmem:[%s2783_s3 + $0x28] sm:$0xff]   ;;  %v2023_v3 = vld [vmem:[%s2783_s3 + $0x38] sm:$0xff]  }
 0x126   : > { %v1869_v27 = vpop.f32.mrf.mxu0  ;;  %1883 = vmatpush3.bf16.msra.mxu1 %v812_v22  ;;  %v2015_v22 = vld [vmem:[%s2782_s2 + $0x38] sm:$0xff]   ;;  %v795_v58 = vmax.f32 %v717_v20, 0.0 }
 0x127   : > { %v776_v29 = vadd.f32 %v1869_v27, %v487_v49  ;;  %1884 = vmatprep.subr.bf16.mxu1 %v811_v61  ;;  %v807_v38 = vmax.f32 %v765_v28, 0.0  ;;  %v749_v49 = vadd.f32 %v748_v15, %v452_v26  ;;  %v822_v14 = vpack.c.bf16 %v802_v4, %v801_v12  ;;  %v878_v26 = vpop.permute.xlu0 %877 }
 0x128   : > { %v767_v59 = vpop.f32.mrf.mxu0  ;;  %v800_v15 = vmax.f32 %v736_v0, 0.0  ;;  %v819_v62 = vpack.c.bf16 %v796_v21, %v795_v58 }
 0x129   : > { %v810_v32 = vmax.f32 %v776_v29, 0.0  ;;  %v768_v33 = vadd.f32 %v767_v59, %v477_v7  ;;  %v803_v7 = vmax.f32 %v749_v49, 0.0  ;;  %v883_v29 = vpop.permute.xlu1 %882 }
 0x12a   : > { %1885 = vmatpush3.bf16.msra.mxu1 %v811_v61  ;;  %v821_v19 = vpack.c.bf16 %v800_v15, %v799_v54  ;;  %v2022_v61 = vld [vmem:[%s2783_s3 + $0x30] sm:$0xff]  }
 0x12b   : > { %v826_v39 = vpack.c.bf16 %v810_v32, %v809_v30  ;;  %v808_v40 = vmax.f32 %v768_v33, 0.0  ;;  %v823_v10 = vpack.c.bf16 %v804_v55, %v803_v7  ;;  %v888_v27 = vpop.permute.xlu0 %887 }
 0x12d   : > { %v825_v47 = vpack.c.bf16 %v808_v40, %v807_v38  ;;  %1887 = vmatmul.mubr.bf16.vlgmr.msra.gmra.mxu1 %v2009_v34  ;;  %1902 = vmatprep.subr.bf16.mxu0 %v826_v39  ;;  %v893_v63 = vpop.permute.xlu1 %892 }
 0x12e   : > { %1934 = vmatprep.subr.bf16.mxu1 %v826_v39  ;;  %1903 = vmatpush3.bf16.msra.mxu0 %v826_v39 }
 0x12f   : > { %1942 = vmatpush3.bf16.msra.mxu1 %v826_v39  ;;  %1904 = vmatprep.subr.bf16.mxu0 %v825_v47  ;;  %v898_v28 = vpop.permute.xlu0 %897 }
 0x130   : > { %1935 = vmatprep.subr.bf16.mxu1 %v825_v47  ;;  %1890 = vmatprep.mubr.bf16.mxu1 %v2010_v43 }
 0x131   : > { %v2634_v32 = vpop.permute.xlu1 %902 }
 0x132   : > { %1905 = vmatpush3.bf16.msra.mxu0 %v825_v47 }
 0x133   : > { %1943 = vmatpush3.bf16.msra.mxu1 %v825_v47  ;;  %1906 = vmatprep.subr.bf16.mxu0 %v824_v53  ;;  %v2630_v59 = vpop.permute.xlu0 %907 }
 0x134   : > { %1936 = vmatprep.subr.bf16.mxu1 %v824_v53 }
 0x135   : > { %1891 = vmatmul.mubr.bf16.gmra.mxu1 %v2011_v56  ;;  %v2638_v34 = vpop.permute.xlu1 %912 }
 0x136   : > { %1907 = vmatpush3.bf16.msra.mxu0 %v824_v53  ;;  %1894 = vmatprep.mubr.bf16.mxu1 %v2012_v2 }
 0x137   : > { %1944 = vmatpush3.bf16.msra.mxu1 %v824_v53  ;;  %1908 = vmatprep.subr.bf16.mxu0 %v823_v10  ;;  %v2632_v30 = vpop.permute.xlu0 %917 }
 0x138   : > { %1937 = vmatprep.subr.bf16.mxu1 %v823_v10 }
 0x139   : > { %v2642_v36 = vpop.permute.xlu1 %922 }
 0x13a   : > { %1909 = vmatpush3.bf16.msra.mxu0 %v823_v10 }
 0x13b   : > { %1945 = vmatpush3.bf16.msra.mxu1 %v823_v10  ;;  %1910 = vmatprep.subr.bf16.mxu0 %v822_v14  ;;  %v2636_v33 = vpop.permute.xlu0 %927 }
 0x13c   : > { %1938 = vmatprep.subr.bf16.mxu1 %v822_v14 }
 0x13d   : > { %1895 = vmatmul.mubr.bf16.gmra.mxu1 %v2013_v8  ;;  %v2646_v39 = vpop.permute.xlu1 %932 }
 0x13e   : > { %1911 = vmatpush3.bf16.msra.mxu0 %v822_v14  ;;  %1898 = vmatprep.mubr.bf16.mxu1 %v2014_v16 }
 0x13f   : > { %1946 = vmatpush3.bf16.msra.mxu1 %v822_v14  ;;  %1912 = vmatprep.subr.bf16.mxu0 %v821_v19  ;;  %v2640_v35 = vpop.permute.xlu0 %937 }
 0x140   : > { %1939 = vmatprep.subr.bf16.mxu1 %v821_v19 }
 0x141   : > { %v2650_v41 = vpop.permute.xlu1 %942 }
 0x142   : > { %1913 = vmatpush3.bf16.msra.mxu0 %v821_v19 }
 0x143   : > { %1947 = vmatpush3.bf16.msra.mxu1 %v821_v19  ;;  %1914 = vmatprep.subr.bf16.mxu0 %v820_v31  ;;  %v2644_v38 = vpop.permute.xlu0 %947 }
 0x144   : > { %1940 = vmatprep.subr.bf16.mxu1 %v820_v31 }
 0x145   : > { %1899 = vmatmul.mubr.bf16.gmra.mxu1 %v2015_v22  ;;  %v2654_v44 = vpop.permute.xlu1 %952 }
 0x146   : > { %1915 = vmatpush3.bf16.msra.mxu0 %v820_v31  ;;  %1922 = vmatprep.mubr.bf16.mxu1 %v2017_v45 }
 0x147   : > { %1948 = vmatpush3.bf16.msra.mxu1 %v820_v31  ;;  %1916 = vmatprep.subr.bf16.mxu0 %v819_v62  ;;  %v2648_v40 = vpop.permute.xlu0 %1134 }
 0x148   : > { %1941 = vmatprep.subr.bf16.mxu1 %v819_v62 }
 0x149   : > { %v2658_v47 = vpop.permute.xlu1 %1139 }
 0x14a   : > { %1917 = vmatpush3.bf16.msra.mxu0 %v819_v62 }
 0x14b   : > { %1949 = vmatpush3.bf16.msra.mxu1 %v819_v62  ;;  %v2652_v43 = vpop.permute.xlu0 %1144 }
 0x14d   : > { %1919 = vmatmul.mubr.bf16.vlgmr.msra.gmra.mxu0 %v2018_v37  ;;  %v2662_v49 = vpop.permute.xlu1 %1149 }
 0x14e   : > { %1923 = vmatmul.mubr.bf16.vlgmr.msra.gmra.mxu1 %v2019_v23 }
 0x14f   : > { %1926 = vmatprep.mubr.bf16.mxu1 %v2020_v24  ;;  %v2656_v46 = vpop.permute.xlu0 %1154 }
 0x151   : > { %v2666_v52 = vpop.permute.xlu1 %1159 }
 0x153   : > { %v2660_v48 = vpop.permute.xlu0 %1164 }
 0x155   : > { %v2670_v55 = vpop.permute.xlu1 %1169 }
 0x156   : > { %1927 = vmatmul.mubr.bf16.gmra.mxu1 %v2021_v25 }
 0x157   : > { %1930 = vmatprep.mubr.bf16.mxu1 %v2022_v61  ;;  %v2664_v51 = vpop.permute.xlu0 %1174 }
 0x159   : > { %v2674_v57 = vpop.permute.xlu1 %1179 }
 0x15b   : > { %v2668_v53 = vpop.permute.xlu0 %1184 }
 0x15d   : > { %v2678_v5 = vpop.permute.xlu1 %1189 }
 0x15e   : > { %1931 = vmatmul.mubr.bf16.gmra.mxu1 %v2023_v3 }
 0x15f   : > { %v2672_v56 = vpop.permute.xlu0 %1194 }
 0x161   : > { %v2680_v4 = vpop.permute.xlu1 %1199 }
 0x163   : > { %v2676_v2 = vpop.permute.xlu0 %1204 }
 0x165   : > { %v2682_v10 = vpop.permute.xlu1 %1209 }
 0x166   : > { %2788 = vst [vmem:[#allocation6_spill] sm:$0xff] %v2682_v10 }
 0x167   : > { %v1410_v7 = vpop.permute.xlu0 %1409 }
 0x169   : > { %v1415_v12 = vpop.permute.xlu1 %1414 }
 0x16b   : > { %v1420_v0 = vpop.permute.xlu0 %1419 }
 0x16d   : > { %v1425_v9 = vpop.permute.xlu1 %1424 }
 0x16f   : > { %v1430_v11 = vpop.permute.xlu0 %1429 }
 0x171   : > { %v1435_v14 = vpop.permute.xlu1 %1434 }
 0x173   : > { %v2684_v13 = vpop.permute.xlu0 %1532 }
 0x175   : > { %v2690_v8 = vpop.permute.xlu1 %1537 }
 0x177   : > { %v2686_v50 = vpop.permute.xlu0 %1542 }
 0x179   : > { %v2692_v18 = vpop.permute.xlu1 %1547 }
 0x17b   : > { %v2688_v15 = vpop.permute.xlu0 %1552 }
 0x17d   : > { %v2694_v62 = vpop.permute.xlu1 %1557 }
 0x17f   : > { %v1440_v6 = vpop.permute.xlu0 %1439 }
 0x183   : > { %v1445_v1 = vpop.permute.xlu0 %1444 }
 0x1ed   : > { %v1888_v16 = vpop.f32.mrf.mxu1 }
 0x1ee   : > { %v1046_v19 = vadd.f32 %v1888_v16, %v888_v27 }
 0x1ef   : > { %v1037_v54 = vpop.f32.mrf.mxu1 }
 0x1f0   : > { %v1038_v17 = vadd.f32 %v1037_v54, %v878_v26  ;;  %v1102_v45 = vmax.f32 %v1046_v19, 0.0  ;;  %v1450_v26 = vpop.permute.xlu0 %1449  ;;  %v2698_v19 = vpop.permute.xlu1 %1562 }
 0x1f1   : > { %v1889_v42 = vpop.f32.mrf.mxu1 }
 0x1f2   : > { %v1100_v20 = vmax.f32 %v1038_v17, 0.0  ;;  %v1049_v31 = vadd.f32 %v1889_v42, %v893_v63  ;;  %v1489_v54 = vmul.f32 %v1420_v0, %v1102_v45 }
 0x1f3   : > { %v1040_v60 = vpop.f32.mrf.mxu1 }
 0x1f4   : > { %v1041_v21 = vadd.f32 %v1040_v60, %v883_v29  ;;  %v1487_v23 = vmul.f32 %v1410_v7, %v1100_v20  ;;  %v1103_v24 = vmax.f32 %v1049_v31, 0.0  ;;  %v1455_v0 = vpop.permute.xlu0 %1454 }
 0x1f5   : > { %v1892_v22 = vpop.f32.mrf.mxu1 }
 0x1f6   : > { %v1101_v58 = vmax.f32 %v1041_v21, 0.0  ;;  %v1062_v27 = vadd.f32 %v1892_v22, %v2630_v59  ;;  %v1490_v63 = vmul.f32 %v1425_v9, %v1103_v24 }
 0x1f7   : > { %v1053_v37 = vpop.f32.mrf.mxu1 }
 0x1f8   : > { %v1488_v25 = vmul.f32 %v1415_v12, %v1101_v58  ;;  %v1054_v61 = vadd.f32 %v1053_v37, %v898_v28  ;;  %v1106_v20 = vmax.f32 %v1062_v27, 0.0 }
 0x1f9   : > { %v1893_v3 = vpop.f32.mrf.mxu1 }
 0x1fa   : > { %v1503_v10 = vadd.f32 %v1488_v25, %v1487_v23  ;;  %v1104_v16 = vmax.f32 %v1054_v61, 0.0  ;;  %v1065_v60 = vadd.f32 %v1893_v3, %v2638_v34  ;;  %v1460_v3 = vpop.permute.xlu0 %1459 }
 0x1fb   : > { %v1056_v17 = vpop.f32.mrf.mxu1 }
 0x1fc   : > { %v1504_v29 = vadd.f32 %v1503_v10, %v1489_v54  ;;  %v1057_v42 = vadd.f32 %v1056_v17, %v2634_v32  ;;  %v1491_v12 = vmul.f32 %v1430_v11, %v1104_v16  ;;  %v1107_v59 = vmax.f32 %v1065_v60, 0.0  ;;  %v2702_v32 = vpop.permute.xlu1 %1567 }
 0x1fd   : > { %v1896_v7 = vpop.f32.mrf.mxu1  ;;  %v1493_v10 = vmul.f32 %v1440_v6, %v1106_v20 }
 0x1fe   : > { %v1505_v28 = vadd.f32 %v1504_v29, %v1490_v63  ;;  %v1105_v31 = vmax.f32 %v1057_v42, 0.0  ;;  %v1494_v25 = vmul.f32 %v1445_v1, %v1107_v59  ;;  %v1465_v60 = vpop.permute.xlu0 %1464 }
 0x1ff   : > { %v1069_v21 = vpop.f32.mrf.mxu1 }
 0x200   : > { %v1506_v45 = vadd.f32 %v1505_v28, %v1491_v12  ;;  %v1492_v58 = vmul.f32 %v1435_v14, %v1105_v31  ;;  %v1070_v22 = vadd.f32 %v1069_v21, %v2632_v30  ;;  %v2705_v14 = vpop.permute.xlu1 %1572  ;;  %v1078_v30 = vadd.f32 %v1896_v7, %v2636_v33 }
 0x201   : > { %v1897_v9 = vpop.f32.mrf.mxu1 }
 0x202   : > { %v1507_v37 = vadd.f32 %v1506_v45, %v1492_v58  ;;  %v1108_v11 = vmax.f32 %v1070_v22, 0.0  ;;  %v1110_v20 = vmax.f32 %v1078_v30, 0.0 }
 0x203   : > { %v1072_v23 = vpop.f32.mrf.mxu1 }
 0x204   : > { %v1508_v24 = vadd.f32 %v1507_v37, %v1493_v10  ;;  %v1073_v34 = vadd.f32 %v1072_v23, %v2642_v36  ;;  %v1495_v17 = vmul.f32 %v1450_v26, %v1108_v11  ;;  %v1081_v36 = vadd.f32 %v1897_v9, %v2646_v39  ;;  %v2709_v28 = vpop.permute.xlu1 %1577 }
 0x205   : > { %v1900_v61 = vpop.f32.mrf.mxu1  ;;  %v1497_v59 = vmul.f32 %v1460_v3, %v1110_v20 }
 0x206   : > { %v1509_v54 = vadd.f32 %v1508_v24, %v1494_v25  ;;  %v1109_v27 = vmax.f32 %v1073_v34, 0.0  ;;  %v1111_v33 = vmax.f32 %v1081_v36, 0.0 }
 0x207   : > { %v1085_v16 = vpop.f32.mrf.mxu1 }
 0x208   : > { %v1510_v63 = vadd.f32 %v1509_v54, %v1495_v17  ;;  %v1496_v29 = vmul.f32 %v1455_v0, %v1109_v27  ;;  %v1086_v26 = vadd.f32 %v1085_v16, %v2640_v35  ;;  %v1470_v0 = vpop.permute.xlu0 %1469  ;;  %v2717_v25 = vpop.permute.xlu1 %1582  ;;  %v1498_v11 = vmul.f32 %v1465_v60, %v1111_v33 }
 0x209   : > { %v1901_v6 = vpop.f32.mrf.mxu1 }
 0x20a   : > { %v1511_v31 = vadd.f32 %v1510_v63, %v1496_v29  ;;  %v1112_v3 = vmax.f32 %v1086_v26, 0.0 }
 0x20b   : > { %v1088_v42 = vpop.f32.mrf.mxu1 }
 0x20c   : > { %v1512_v37 = vadd.f32 %v1511_v31, %v1497_v59  ;;  %v1089_v39 = vadd.f32 %v1088_v42, %v2650_v41  ;;  %v1475_v17 = vpop.permute.xlu0 %1474  ;;  %v1094_v42 = vadd.f32 %v1900_v61, %v2644_v38  ;;  %v1499_v60 = vmul.f32 %v1470_v0, %v1112_v3 }
 0x20d   : > { %v1920_v1 = vpop.f32.mrf.mxu0  ;;  %v1097_v38 = vadd.f32 %v1901_v6, %v2654_v44 }
 0x20e   : > { %v1924_v12 = vpop.f32.mrf.mxu1  ;;  %v1303_v22 = vadd.f32 %v1920_v1, %v2652_v43  ;;  %v1513_v16 = vadd.f32 %v1512_v37, %v1498_v11  ;;  %v1113_v30 = vmax.f32 %v1089_v39, 0.0  ;;  %v1114_v26 = vmax.f32 %v1094_v42, 0.0 }
 0x20f   : > { %v1294_v21 = vpop.f32.mrf.mxu0 }
 0x210   : > { %v1295_v45 = vadd.f32 %v1294_v21, %v2648_v40  ;;  %v1310_v58 = vpop.f32.mrf.mxu1  ;;  %v1359_v35 = vmax.f32 %v1303_v22, 0.0  ;;  %v1588_v21 = vpop.permute.xlu1 %1587 }
 0x211   : > { %v1921_v7 = vpop.f32.mrf.mxu0  ;;  %v1311_v54 = vadd.f32 %v1310_v58, %v2656_v46  ;;  %v1319_v46 = vadd.f32 %v1924_v12, %v2660_v48  ;;  %v1500_v58 = vmul.f32 %v1475_v17, %v1113_v30  ;;  %v1480_v61 = vpop.permute.xlu0 %1479 }
 0x212   : > { %v1925_v10 = vpop.f32.mrf.mxu1  ;;  %v1357_v23 = vmax.f32 %v1295_v45, 0.0  ;;  %v1306_v24 = vadd.f32 %v1921_v7, %v2662_v49  ;;  %v1612_v20 = vmul.f32 %v2686_v50, %v1359_v35  ;;  %v1514_v45 = vadd.f32 %v1513_v16, %v1499_v60 }
 0x213   : > { %v1297_v9 = vpop.f32.mrf.mxu0  ;;  %v1361_v36 = vmax.f32 %v1311_v54, 0.0  ;;  %v1363_v50 = vmax.f32 %v1319_v46, 0.0  ;;  %v2789_v46 = vld [vmem:[#allocation6_spill] sm:$0xff] }
 0x214   : > { %v1298_v34 = vadd.f32 %v1297_v9, %v2658_v47  ;;  %v1313_v40 = vpop.f32.mrf.mxu1  ;;  %v1610_v41 = vmul.f32 %v2684_v13, %v1357_v23  ;;  %v1360_v63 = vmax.f32 %v1306_v24, 0.0  ;;  %v1515_v22 = vadd.f32 %v1514_v45, %v1500_v58  ;;  %v1593_v9 = vpop.permute.xlu1 %1592 }
 0x215   : > { %v1314_v47 = vadd.f32 %v1313_v40, %v2666_v52  ;;  %v1614_v48 = vmul.f32 %v2688_v15, %v1361_v36  ;;  %v1501_v23 = vmul.f32 %v1480_v61, %v1114_v26  ;;  %v1115_v24 = vmax.f32 %v1097_v38, 0.0  ;;  %v1485_v11 = vpop.permute.xlu0 %1484 }
 0x216   : > { %v1358_v27 = vmax.f32 %v1298_v34, 0.0  ;;  %v1928_v43 = vpop.f32.mrf.mxu1  ;;  %v1613_v13 = vmul.f32 %v2692_v18, %v1360_v63  ;;  %v1616_v44 = vmul.f32 %v2698_v19, %v1363_v50 }
 0x217   : > { %v1362_v52 = vmax.f32 %v1314_v47, 0.0  ;;  %v1335_v15 = vadd.f32 %v1928_v43, %v2668_v53 }
 0x218   : > { %v1611_v49 = vmul.f32 %v2690_v8, %v1358_v27  ;;  %v1326_v29 = vpop.f32.mrf.mxu1  ;;  %v1322_v8 = vadd.f32 %v1925_v10, %v2670_v55 }
 0x219   : > { %v1327_v7 = vadd.f32 %v1326_v29, %v2664_v51  ;;  %v1615_v18 = vmul.f32 %v2694_v62, %v1362_v52  ;;  %v1516_v51 = vadd.f32 %v1515_v22, %v1501_v23  ;;  %v1367_v16 = vmax.f32 %v1335_v15, 0.0 }
 0x21a   : > { %v1626_v1 = vadd.f32 %v1611_v49, %v1610_v41  ;;  %v1929_v31 = vpop.f32.mrf.mxu1  ;;  %v1364_v37 = vmax.f32 %v1322_v8, 0.0  ;;  %v1598_v41 = vpop.permute.xlu1 %1597 }
 0x21b   : > { %v1365_v34 = vmax.f32 %v1327_v7, 0.0  ;;  %v1338_v62 = vadd.f32 %v1929_v31, %v2678_v5  ;;  %v1620_v47 = vmul.f32 %v2717_v25, %v1367_v16 }
 0x21c   : > { %v1627_v59 = vadd.f32 %v1626_v1, %v1612_v20  ;;  %v1329_v33 = vpop.f32.mrf.mxu1  ;;  %v1617_v3 = vmul.f32 %v2702_v32, %v1364_v37 }
 0x21d   : > { %v1330_v55 = vadd.f32 %v1329_v33, %v2674_v57  ;;  %v1502_v57 = vmul.f32 %v1485_v11, %v1115_v24  ;;  %v1618_v30 = vmul.f32 %v2705_v14, %v1365_v34  ;;  %v1368_v63 = vmax.f32 %v1338_v62, 0.0 }
 0x21e   : > { %v1628_v12 = vadd.f32 %v1627_v59, %v1613_v13  ;;  %v1932_v0 = vpop.f32.mrf.mxu1  ;;  %v1603_v1 = vpop.permute.xlu1 %1602 }
 0x21f   : > { %v1366_v54 = vmax.f32 %v1330_v55, 0.0  ;;  %v1517_v53 = vadd.f32 %v1516_v51, %v1502_v57  ;;  %v1351_v29 = vadd.f32 %v1932_v0, %v2676_v2  ;;  %v1621_v20 = vmul.f32 %v1588_v21, %v1368_v63 }
 0x220   : > { %v1629_v39 = vadd.f32 %v1628_v12, %v1614_v48  ;;  %v1342_v10 = vpop.f32.mrf.mxu1 }
 0x221   : > { %v1343_v19 = vadd.f32 %v1342_v10, %v2672_v56  ;;  %v1619_v49 = vmul.f32 %v2709_v28, %v1366_v54  ;;  %v1518_v60 = vrot.slane %v1517_v53, 4  ;;  %v1371_v31 = vmax.f32 %v1351_v29, 0.0 }
 0x222   : > { %v1630_v6 = vadd.f32 %v1629_v39, %v1615_v18  ;;  %v1933_v40 = vpop.f32.mrf.mxu1  ;;  %v1608_v52 = vpop.permute.xlu1 %1607 }
 0x223   : > { %v1369_v42 = vmax.f32 %v1343_v19, 0.0  ;;  %v1354_v36 = vadd.f32 %v1933_v40, %v2789_v46  ;;  %v1519_v13 = vadd.f32 %v1518_v60, %v1517_v53  ;;  %v1624_v59 = vmul.f32 %v1603_v1, %v1371_v31  ;;  %v1527_v39 = vpop.permute.xlu0 %1526 }
 0x224   : > { %v1631_v35 = vadd.f32 %v1630_v6, %v1616_v44  ;;  %v1345_v27 = vpop.f32.mrf.mxu1 }
 0x225   : > { %v1346_v32 = vadd.f32 %v1345_v27, %v2680_v4  ;;  %v1622_v45 = vmul.f32 %v1593_v9, %v1369_v42  ;;  %v1372_v8 = vmax.f32 %v1354_v36, 0.0  ;;  %v1520_v2 = vrot.slane %v1519_v13, 2 }
 0x226   : > { %v1632_v17 = vadd.f32 %v1631_v35, %v1617_v3  ;;  %v1650_v18 = vpop.permute.xlu1 %1649 }
 0x227   : > { %v1370_v56 = vmax.f32 %v1346_v32, 0.0  ;;  %v1625_v33 = vmul.f32 %v1608_v52, %v1372_v8  ;;  %v1521_v61 = vadd.f32 %v1520_v2, %v1519_v13 }
 0x228   : > { %v1633_v43 = vadd.f32 %v1632_v17, %v1618_v30 }
 0x229   : > { %v1623_v4 = vmul.f32 %v1598_v41, %v1370_v56  ;;  %v1522_v12 = vrot.slane %v1521_v61, 1 }
 0x22a   : > { %v1634_v5 = vadd.f32 %v1633_v43, %v1619_v49 }
 0x22b   : > { %v1523_v0 = vadd.f32 %v1522_v12, %v1521_v61 }
 0x22c   : > { %v1635_v14 = vadd.f32 %v1634_v5, %v1620_v47 }
 0x22d   : > { %v1529_v55 = vadd.f32 %v1527_v39, %v1523_v0 }
 0x22e   : > { %v1636_v58 = vadd.f32 %v1635_v14, %v1621_v20 }
 0x230   : > { %v1637_v28 = vadd.f32 %v1636_v58, %v1622_v45 }
 0x232   : > { %v1638_v25 = vadd.f32 %v1637_v28, %v1623_v4 }
 0x234   : > { %v1639_v21 = vadd.f32 %v1638_v25, %v1624_v59 }
 0x236   : > { %v1640_v26 = vadd.f32 %v1639_v21, %v1625_v33 }
 0x238   : > { %v1641_v38 = vrot.slane %v1640_v26, 4 }
 0x23a   : > { %v1642_v50 = vadd.f32 %v1641_v38, %v1640_v26 }
 0x23c   : > { %v1643_v48 = vrot.slane %v1642_v50, 2 }
 0x23e   : > { %v1644_v7 = vadd.f32 %v1643_v48, %v1642_v50 }
 0x240   : > { %v1645_v22 = vrot.slane %v1644_v7, 1 }
 0x242   : > { %v1646_v37 = vadd.f32 %v1645_v22, %v1644_v7 }
 0x244   : > { %v1652_v10 = vadd.f32 %v1650_v18, %v1646_v37 }
 0x246   : > { %v1653_v9 = vmin.f32 %v1529_v55, %v1652_v10 }
 0x248   : > { %1654 = vst [vmem:[%s260_s30] sm:$0x1] %v1653_v9 }
 0x249   : > { %2037 = shalt.err (!%p2034_p5)
}
 0x24a   : > { %s2038_s14 = scalar_lea.hbm %s1666_s9, 16  ;;  %s2042_s17 = scalar_lea.hbm %s2785_s5, 48 }
 0x24b   : > { %p2039_p7 = scmp.ne.s32.totalorder %s1666_s9, %s2038_s14  ;;  %p2043_p11 = scmp.lt.s32.totalorder %s1666_s9, %s2785_s5 }
 0x24c   : > { %p2044_p12 = scmp.lt.s32.totalorder %s2042_s17, %s2038_s14 }
 0x24d   : > { %p2040_p9 = pnand %p2039_p7, %p2156_p6 }
 0x24e   : > { %p2045_p13 = por %p2044_p12, %p2043_p11 }
 0x24f   : > { %p2041_p10 = pneg %p2040_p9 }
 0x251   : > { %p2046_p0 = pnand %p2045_p13, %p2041_p10 }
 0x253   : > { %2049 = shalt.err (!%p2046_p0)
}
 0x254   : > { %1950 = dma.vmem_to_hbm [thread:$0]  (%p2156_p6), %s1669_s6, 16, %s1666_s9, %s1656_s10  }
 0x255 PF: > { %p1956_p1 = scmp.ge.s32.totalorder %s2084_s21, 2  ;;  %s1680_s26 = sand.u32 1, %s2072_s18  }
 0x256   : > { %s1681_s30 = scalar_lea.sflag [#allocation4], %s1680_s26 }
 0x257   : > { %p1953_p2 = pnand %p1956_p1, %p2160_p8 }
 0x259   : > { %p1954_p3 = pneg %p1953_p2 }
 0x25b   : > { %2067 = dma.done.wait (%p1954_p3), %s1681_s30, 16  }
 0x25c   : > { %2069 = vsyncadd (%p1954_p3), %s1681_s30, 4294967280  ;;  %p15_p4 = scmp.ge.s32.totalorder %s2141_s24, 5   ;;  %s2790_s18 = smov %s2076_s19 }
 0x25d   : > { %s2791_s19 = smov %s2080_s20  ;;  %s2792_s20 = smov %s2154_s27 }
 0x25e   : > { %s2793_s21 = smov %s2141_s24  ;;  %17 = sbr.rel (!%p15_p4) target bundleno = 3 (0x3), region = 118 }
 0x263   :  { %1685 = vsyncpa [#allocation4], 1 }
 0x264   :  { %1687 = vsyncpa [#allocation4 + $0x1], 1 }

</bundles_post_ra>
